<compile_context>
chip_gen: v6e
topology: v6e:2x2x1
jax: 0.10.0
libtpu: 0.0.40
codegen_flags: <defaults>
</compile_context>

<pallas_src>
import functools

import jax
import jax.numpy as jnp
import numpy as np
from jax.experimental import pallas as pl
from jax.experimental.pallas import tpu as pltpu

_EPS = 1e-8                       # torch F.cosine_similarity default eps
_HP = jax.lax.Precision.HIGHEST   # reference-only (exact f32)


# ----------------------------------------------------------------------------
# Pallas kernel: full GCNResidualLayer forward for one batch element.
# ----------------------------------------------------------------------------
def _gcn_residual_kernel(K, dil, K2p,
                         x_ref, m_ref, wbig_ref, badj_ref,
                         bg1_ref, bg2_ref, wc_ref, bc_ref, o_ref):
    x = x_ref[0]                       # (C, T) f32
    m = m_ref[0]                       # (1, T)
    C, T = x.shape
    K2 = K * K
    kc = (K - 1) // 2                  # only the center fold tap survives F.fold

    def shift(v, off):
        """v[..., t] -> v[..., t + off], zero filled (off is a static int)."""
        if off == 0:
            return v
        if abs(off) >= T:
            return jnp.zeros_like(v)
        r = pltpu.roll(v, (-off) % T, v.ndim - 1)      # == jnp.roll(v, -off, -1)
        lane = jax.lax.broadcasted_iota(jnp.int32, v.shape, v.ndim - 1)
        keep = lane < (T - off) if off > 0 else lane >= (-off)
        return jnp.where(keep, r, 0.0)

    def mm(a, b):                      # single-pass bf16 MXU, f32 accumulate
        return jnp.dot(a.astype(jnp.bfloat16), b.astype(jnp.bfloat16),
                       preferred_element_type=jnp.float32)

    # One fused MXU push: rows = [W_g1^T | W_g2^T | conv_adj tap 0..K-1 (row-padded)].
    big = mm(wbig_ref[...], x)                         # (2C + K*K2p, T)
    g12 = big[0:2 * C]                                 # [W_g1^T @ x ; W_g2^T @ x]

    # --- conv_dilated_adj + channel softmax -> adjacency row kc for gcn_dilated2
    acc = None
    for j in range(K):
        off = (j - kc) * dil
        tap = shift(big[2 * C + j * K2p: 2 * C + j * K2p + K2], off)   # (K2, T)
        acc = tap if acc is None else acc + tap
    a = acc + badj_ref[...]                            # (K2, T)
    a = a - jnp.max(a, axis=0, keepdims=True)
    e = jnp.exp(a)
    adj2 = e[kc * K: kc * K + K] / jnp.sum(e, axis=0, keepdims=True)   # (K, T)

    # --- cosine-pairwise adjacency (row kc), softmax over TIME -> gcn_dilated1
    sq = jnp.sum(x * x, axis=0, keepdims=True)         # (1, T)
    cos_rows = []
    for j in range(K):
        off = (j - kc) * dil
        num = jnp.sum(x * shift(x, off), axis=0, keepdims=True)
        den = jnp.sqrt(jnp.maximum(sq * shift(sq, off), _EPS * _EPS))
        cos_rows.append(num / den)
    cos = jnp.concatenate(cos_rows, axis=0)            # (K, T)
    cos = cos - jnp.max(cos, axis=1, keepdims=True)
    ec = jnp.exp(cos)
    adj1 = ec / jnp.sum(ec, axis=1, keepdims=True)     # (K, T)

    # --- graph mixing: out_i[c, t] = sum_j adj_i[j, t] * (W_i^T x)[c, t + off_j]
    out1 = jnp.zeros((C, T), jnp.float32)
    out2 = jnp.zeros((C, T), jnp.float32)
    for j in range(K):
        off = (j - kc) * dil
        s = shift(g12, off)                            # one roll feeds both heads
        out1 = out1 + adj1[j:j + 1] * s[0:C]
        out2 = out2 + adj2[j:j + 1] * s[C:2 * C]
    out1 = jnp.maximum(out1 + bg1_ref[...], 0.0)       # bias after mixing, then ReLU
    out2 = jnp.maximum(out2 + bg2_ref[...], 0.0)

    # conv_1x1 + residual + mask.
    # TODO(synk): nn.Dropout() is identity in eval/inference; train-mode dropout not implemented.
    y = mm(wc_ref[...], out1 + out2) + bc_ref[...]
    o_ref[0] = (x + y) * m


# ----------------------------------------------------------------------------
# Wrapper
# ----------------------------------------------------------------------------
def gcn_residual_forward(params, x, mask, *, df_size, dilation):
    """Matches GCNResidualLayer(dilation, df_size, C, C).forward(x, mask) (eval mode)."""
    B, C, T = x.shape
    K = int(df_size)
    K2 = K * K
    K2p = -(-K2 // 8) * 8        # pad each conv_adj tap block to a sublane multiple

    w1t = jnp.transpose(params["w_g1"])      # (C_out, C_in)
    w2t = jnp.transpose(params["w_g2"])
    taps = [jnp.pad(params["w_adj"][:, :, j], ((0, K2p - K2), (0, 0)))
            for j in range(K)]
    w_big = jnp.concatenate([w1t, w2t] + taps, axis=0).astype(jnp.float32)
    R = w_big.shape[0]

    b_adj = params["b_adj"].reshape(K2, 1).astype(jnp.float32)
    b_g1 = params["b_g1"].reshape(C, 1).astype(jnp.float32)
    b_g2 = params["b_g2"].reshape(C, 1).astype(jnp.float32)
    w_c = params["w_c"].astype(jnp.float32)
    b_c = params["b_c"].reshape(C, 1).astype(jnp.float32)
    m_row = mask[:, 0:1, :].astype(jnp.float32)

    # Explicit VMEM budget: double-buffered per-step blocks + weights + live slabs.
    blk = (C * T + T + C * T) * 4
    wts = (R * C + K2 + 2 * C + C * C + C) * 4
    live = (R * T + 12 * C * T + 6 * K2 * T) * 4
    vmem_limit = int(min(max(2 * (blk + wts) + live + (8 << 20), 32 << 20), 64 << 20))

    kernel = functools.partial(_gcn_residual_kernel, K, int(dilation), K2p)
    return pl.pallas_call(
        kernel,
        out_shape=jax.ShapeDtypeStruct((B, C, T), jnp.float32),
        grid=(B,),
        in_specs=[
            pl.BlockSpec((1, C, T), lambda b: (b, 0, 0)),   # x
            pl.BlockSpec((1, 1, T), lambda b: (b, 0, 0)),   # mask[:, 0:1, :]
            pl.BlockSpec((R, C), lambda b: (0, 0)),         # stacked weights
            pl.BlockSpec((K2, 1), lambda b: (0, 0)),        # conv_dilated_adj bias
            pl.BlockSpec((C, 1), lambda b: (0, 0)),         # gcn_dilated1 bias
            pl.BlockSpec((C, 1), lambda b: (0, 0)),         # gcn_dilated2 bias
            pl.BlockSpec((C, C), lambda b: (0, 0)),         # conv_1x1 weight
            pl.BlockSpec((C, 1), lambda b: (0, 0)),         # conv_1x1 bias
        ],
        out_specs=pl.BlockSpec((1, C, T), lambda b: (b, 0, 0)),
        compiler_params=pltpu.CompilerParams(
            dimension_semantics=("parallel",),
            vmem_limit_bytes=vmem_limit),
    )(x.astype(jnp.float32), m_row, w_big, b_adj, b_g1, b_g2, w_c, b_c)


# ----------------------------------------------------------------------------
# Pure-JAX reference: literal translation of the PyTorch module (exact f32).
# ----------------------------------------------------------------------------
def _shift_time(v, off):
    T = v.shape[-1]
    if off == 0:
        return v
    if abs(off) >= T:
        return jnp.zeros_like(v)
    if off > 0:
        pad = jnp.zeros(v.shape[:-1] + (off,), v.dtype)
        return jnp.concatenate([v[..., off:], pad], axis=-1)
    pad = jnp.zeros(v.shape[:-1] + (-off,), v.dtype)
    return jnp.concatenate([pad, v[..., :T + off]], axis=-1)


def _unfold_taps(x, K, dil):
    """taps[b, j, t, c] = x[b, c, t + (j - kc)*dil], zero padded (== F.unfold path)."""
    kc = (K - 1) // 2
    taps = [_shift_time(x, (j - kc) * dil) for j in range(K)]
    return jnp.transpose(jnp.stack(taps, axis=1), (0, 1, 3, 2))    # (B, K, T, C)


def _ref_drc_gcn(x, weight, bias, K, dil, adj=None):
    """Literal DRCGraphConvolution.forward."""
    B, C, T = x.shape
    p = (dil * (K - 1)) // 2
    inp = _unfold_taps(x, K, dil)                                   # (B, K, T, C)
    if adj is None:
        w12 = jnp.einsum("bitc,bjtc->btij", inp, inp, precision=_HP)
        w11 = jnp.sum(inp * inp, axis=-1)                           # (B, K, T)
        prod = jnp.einsum("bit,bjt->btij", w11, w11, precision=_HP)
        cos = w12 / jnp.sqrt(jnp.maximum(prod, _EPS * _EPS))
        adj = jax.nn.softmax(cos.reshape(B, T, K * K), axis=1).reshape(B, T, K, K)
    sup = jnp.einsum("bjtc,co->btjo", inp, weight, precision=_HP)   # (B, T, K, Cout)
    out = jnp.einsum("btij,btjo->btio", adj, sup, precision=_HP) + bias
    out = jnp.transpose(out, (0, 3, 2, 1))                          # (B, Cout, K, T)
    # F.fold((1, T), (K, 1), dilation=(dil, 1), padding=(p, 0)): only taps with
    # -p + k*dil == 0 land inside the height-1 output window.
    res = jnp.zeros((B, out.shape[1], T), out.dtype)
    for k in range(K):
        if -p + k * dil == 0:
            res = res + out[:, :, k, :]
    return res


def reference_forward(params, x, mask, *, df_size, dilation):
    B, C, T = x.shape
    K = int(df_size)
    taps = _unfold_taps(x, K, dilation)                             # (B, K, T, C)
    A = jnp.einsum("qcj,bjtc->bqt", params["w_adj"], taps, precision=_HP)
    A = A + params["b_adj"][None, :, None]
    adj = jnp.transpose(jax.nn.softmax(A, axis=1), (0, 2, 1)).reshape(B, T, K, K)
    out1 = _ref_drc_gcn(x, params["w_g1"], params["b_g1"], K, dilation, adj=None)
    out2 = _ref_drc_gcn(x, params["w_g2"], params["b_g2"], K, dilation, adj=adj)
    out = jnp.maximum(out1, 0.0) + jnp.maximum(out2, 0.0)
    out = jnp.einsum("oc,bct->bot", params["w_c"], out, precision=_HP)
    out = out + params["b_c"][None, :, None]
    return (x + out) * mask[:, 0:1, :]


# ----------------------------------------------------------------------------
# Deterministic parameter init (shapes from GCNResidualLayer.__init__)
# ----------------------------------------------------------------------------
def init_params(key, C, K):
    ks = jax.random.split(key, 8)
    s = 0.1
    K2 = K * K
    p = {
        # conv_dilated_adj: Conv1d(C, K*K, K)  weight (K*K, C, K), bias (K*K,)
        "w_adj": jax.random.normal(ks[0], (K2, C, K)) * s,
        "b_adj": jax.random.normal(ks[1], (K2,)) * s,
        # gcn_dilated{1,2}.weight: (in_features, out_features), bias (out_features,)
        "w_g1": jax.random.normal(ks[2], (C, C)) * s,
        "b_g1": jax.random.normal(ks[3], (C,)) * s,
        "w_g2": jax.random.normal(ks[4], (C, C)) * s,
        "b_g2": jax.random.normal(ks[5], (C,)) * s,
        # conv_1x1: Conv1d(C, C, 1)  weight (C, C, 1) -> (C, C)
        "w_c": jax.random.normal(ks[6], (C, C)) * s,
        "b_c": jax.random.normal(ks[7], (C,)) * s,
    }
    return jax.tree.map(lambda a: a.astype(jnp.float32), p)


if __name__ == "__main__":
    B, C, T = 2, 16, 128     # batch, channels (in_channels == out_channels), time
    K, dil = 3, 2            # df_size, dilation

    key = jax.random.PRNGKey(0)
    kp, kx = jax.random.split(key)
    params = init_params(kp, C, K)
    x = jax.random.normal(kx, (B, C, T), dtype=jnp.float32)
    mask = jnp.ones((B, C, T), dtype=jnp.float32)
    mask = mask.at[1, :, T - 32:].set(0.0)   # ragged-length style masking

    out = gcn_residual_forward(params, x, mask, df_size=K, dilation=dil)
    out = jax.block_until_ready(out)

    ref = reference_forward(params, x, mask, df_size=K, dilation=dil)
    np.testing.assert_allclose(np.asarray(out), np.asarray(ref),
                               rtol=2e-2, atol=2e-2)
    print("KERNEL_OK")
</pallas_src>

<mosaic_0001>
module attributes {stable_mosaic.version = 11 : i64} {
  func.func @_gcn_residual_kernel(%arg0: i32, %arg1: memref<1x16x128xf32, #tpu.memory_space<vmem>>, %arg2: memref<1x1x128xf32, #tpu.memory_space<vmem>>, %arg3: memref<80x16xf32, #tpu.memory_space<vmem>>, %arg4: memref<9x1xf32, #tpu.memory_space<vmem>>, %arg5: memref<16x1xf32, #tpu.memory_space<vmem>>, %arg6: memref<16x1xf32, #tpu.memory_space<vmem>>, %arg7: memref<16x16xf32, #tpu.memory_space<vmem>>, %arg8: memref<16x1xf32, #tpu.memory_space<vmem>>, %arg9: memref<1x16x128xf32, #tpu.memory_space<vmem>>) attributes {dimension_semantics = [#tpu.dimension_semantics<parallel>], iteration_bounds = array<i64: 2>, scalar_prefetch = 0 : i64, scratch_operands = 0 : i64, tpu.core_type = #tpu.core_type<tc>, window_params = [{transform_indices = @transform_0, window_bounds = array<i64: 1, 16, 128>}, {transform_indices = @transform_1, window_bounds = array<i64: 1, 1, 128>}, {pipeline_mode = #tpu.pipeline_mode<synchronous>, transform_indices = @transform_2, window_bounds = array<i64: 80, 16>}, {pipeline_mode = #tpu.pipeline_mode<synchronous>, transform_indices = @transform_3, window_bounds = array<i64: 9, 1>}, {pipeline_mode = #tpu.pipeline_mode<synchronous>, transform_indices = @transform_4, window_bounds = array<i64: 16, 1>}, {pipeline_mode = #tpu.pipeline_mode<synchronous>, transform_indices = @transform_5, window_bounds = array<i64: 16, 1>}, {pipeline_mode = #tpu.pipeline_mode<synchronous>, transform_indices = @transform_6, window_bounds = array<i64: 16, 16>}, {pipeline_mode = #tpu.pipeline_mode<synchronous>, transform_indices = @transform_7, window_bounds = array<i64: 16, 1>}, {transform_indices = @transform_8, window_bounds = array<i64: 1, 16, 128>}]} {
    %c0 = arith.constant 0 : index
    %c0_0 = arith.constant 0 : index
    %c0_1 = arith.constant 0 : index
    %0 = vector.load %arg1[%c0, %c0_0, %c0_1] : memref<1x16x128xf32, #tpu.memory_space<vmem>>, vector<1x16x128xf32>
    %1 = vector.shape_cast %0 : vector<1x16x128xf32> to vector<16x128xf32>
    %c0_2 = arith.constant 0 : index
    %c0_3 = arith.constant 0 : index
    %c0_4 = arith.constant 0 : index
    %2 = vector.load %arg2[%c0_2, %c0_3, %c0_4] : memref<1x1x128xf32, #tpu.memory_space<vmem>>, vector<1x1x128xf32>
    %3 = vector.shape_cast %2 : vector<1x1x128xf32> to vector<1x128xf32>
    %c0_5 = arith.constant 0 : index
    %c0_6 = arith.constant 0 : index
    %4 = vector.load %arg3[%c0_5, %c0_6] : memref<80x16xf32, #tpu.memory_space<vmem>>, vector<80x16xf32>
    %5 = arith.truncf %4 : vector<80x16xf32> to vector<80x16xbf16>
    %6 = arith.truncf %1 : vector<16x128xf32> to vector<16x128xbf16>
    %cst = arith.constant dense<0.000000e+00> : vector<80x128xf32>
    %7 = tpu.matmul %5, %6, %cst {dimension_numbers = #tpu.dot_dimension_numbers<[1], [0], [0], [1], [0, 0, 1, 1], [], []>} : vector<80x16xbf16>, vector<16x128xbf16>, vector<80x128xf32> -> vector<80x128xf32>
    %8 = vector.extract_strided_slice %7 {offsets = [0, 0], sizes = [32, 128], strides = [1, 1]} : vector<80x128xf32> to vector<32x128xf32>
    %9 = vector.extract_strided_slice %7 {offsets = [32, 0], sizes = [9, 128], strides = [1, 1]} : vector<80x128xf32> to vector<9x128xf32>
    %c2_i32 = arith.constant 2 : i32
    %10 = tpu.dynamic_rotate %9 by %c2_i32 dim 1 : vector<9x128xf32>, i32 -> vector<9x128xf32>
    %11 = tpu.iota {dimensions = array<i32: 1>} : vector<9x128xi32>
    %c2_i32_7 = arith.constant 2 : i32
    %12 = vector.broadcast %c2_i32_7 : i32 to vector<9x128xi32>
    %13 = arith.cmpi sge, %11, %12 : vector<9x128xi32>
    %cst_8 = arith.constant 0.000000e+00 : f32
    %14 = vector.broadcast %cst_8 : f32 to vector<9x128xf32>
    %15 = arith.select %13, %10, %14 : vector<9x128xi1>, vector<9x128xf32>
    %16 = vector.extract_strided_slice %7 {offsets = [48, 0], sizes = [9, 128], strides = [1, 1]} : vector<80x128xf32> to vector<9x128xf32>
    %17 = arith.addf %15, %16 : vector<9x128xf32>
    %18 = vector.extract_strided_slice %7 {offsets = [64, 0], sizes = [9, 128], strides = [1, 1]} : vector<80x128xf32> to vector<9x128xf32>
    %c126_i32 = arith.constant 126 : i32
    %19 = tpu.dynamic_rotate %18 by %c126_i32 dim 1 : vector<9x128xf32>, i32 -> vector<9x128xf32>
    %20 = tpu.iota {dimensions = array<i32: 1>} : vector<9x128xi32>
    %c126_i32_9 = arith.constant 126 : i32
    %21 = vector.broadcast %c126_i32_9 : i32 to vector<9x128xi32>
    %22 = arith.cmpi slt, %20, %21 : vector<9x128xi32>
    %cst_10 = arith.constant 0.000000e+00 : f32
    %23 = vector.broadcast %cst_10 : f32 to vector<9x128xf32>
    %24 = arith.select %22, %19, %23 : vector<9x128xi1>, vector<9x128xf32>
    %25 = arith.addf %17, %24 : vector<9x128xf32>
    %c0_11 = arith.constant 0 : index
    %c0_12 = arith.constant 0 : index
    %26 = vector.load %arg4[%c0_11, %c0_12] : memref<9x1xf32, #tpu.memory_space<vmem>>, vector<9x1xf32>
    %27 = vector.broadcast %26 : vector<9x1xf32> to vector<9x128xf32>
    %28 = arith.addf %25, %27 : vector<9x128xf32>
    %cst_13 = arith.constant dense<0xFF800000> : vector<128xf32>
    %29 = vector.multi_reduction <maximumf>, %28, %cst_13 [0] : vector<9x128xf32> to vector<128xf32>
    %30 = vector.shape_cast %29 : vector<128xf32> to vector<1x128xf32>
    %31 = vector.broadcast %30 : vector<1x128xf32> to vector<9x128xf32>
    %32 = arith.subf %28, %31 : vector<9x128xf32>
    %33 = math.exp %32 : vector<9x128xf32>
    %34 = vector.extract_strided_slice %33 {offsets = [3, 0], sizes = [3, 128], strides = [1, 1]} : vector<9x128xf32> to vector<3x128xf32>
    %cst_14 = arith.constant dense<0.000000e+00> : vector<128xf32>
    %35 = vector.multi_reduction <add>, %33, %cst_14 [0] : vector<9x128xf32> to vector<128xf32>
    %36 = vector.shape_cast %35 : vector<128xf32> to vector<1x128xf32>
    %37 = vector.broadcast %36 : vector<1x128xf32> to vector<3x128xf32>
    %38 = arith.divf %34, %37 : vector<3x128xf32>
    %39 = arith.mulf %1, %1 : vector<16x128xf32>
    %cst_15 = arith.constant dense<0.000000e+00> : vector<128xf32>
    %40 = vector.multi_reduction <add>, %39, %cst_15 [0] : vector<16x128xf32> to vector<128xf32>
    %41 = vector.shape_cast %40 : vector<128xf32> to vector<1x128xf32>
    %c2_i32_16 = arith.constant 2 : i32
    %42 = tpu.dynamic_rotate %1 by %c2_i32_16 dim 1 : vector<16x128xf32>, i32 -> vector<16x128xf32>
    %43 = tpu.iota {dimensions = array<i32: 1>} : vector<16x128xi32>
    %c2_i32_17 = arith.constant 2 : i32
    %44 = vector.broadcast %c2_i32_17 : i32 to vector<16x128xi32>
    %45 = arith.cmpi sge, %43, %44 : vector<16x128xi32>
    %cst_18 = arith.constant 0.000000e+00 : f32
    %46 = vector.broadcast %cst_18 : f32 to vector<16x128xf32>
    %47 = arith.select %45, %42, %46 : vector<16x128xi1>, vector<16x128xf32>
    %48 = arith.mulf %1, %47 : vector<16x128xf32>
    %cst_19 = arith.constant dense<0.000000e+00> : vector<128xf32>
    %49 = vector.multi_reduction <add>, %48, %cst_19 [0] : vector<16x128xf32> to vector<128xf32>
    %50 = vector.shape_cast %49 : vector<128xf32> to vector<1x128xf32>
    %c2_i32_20 = arith.constant 2 : i32
    %51 = tpu.dynamic_rotate %41 by %c2_i32_20 dim 1 : vector<1x128xf32>, i32 -> vector<1x128xf32>
    %52 = tpu.iota {dimensions = array<i32: 1>} : vector<1x128xi32>
    %c2_i32_21 = arith.constant 2 : i32
    %53 = vector.broadcast %c2_i32_21 : i32 to vector<1x128xi32>
    %54 = arith.cmpi sge, %52, %53 : vector<1x128xi32>
    %cst_22 = arith.constant 0.000000e+00 : f32
    %55 = vector.broadcast %cst_22 : f32 to vector<1x128xf32>
    %56 = arith.select %54, %51, %55 : vector<1x128xi1>, vector<1x128xf32>
    %57 = arith.mulf %41, %56 : vector<1x128xf32>
    %cst_23 = arith.constant 1.000000e-16 : f32
    %58 = vector.broadcast %cst_23 : f32 to vector<1x128xf32>
    %59 = arith.maximumf %57, %58 : vector<1x128xf32>
    %60 = math.sqrt %59 : vector<1x128xf32>
    %61 = arith.divf %50, %60 : vector<1x128xf32>
    %62 = arith.mulf %1, %1 : vector<16x128xf32>
    %cst_24 = arith.constant dense<0.000000e+00> : vector<128xf32>
    %63 = vector.multi_reduction <add>, %62, %cst_24 [0] : vector<16x128xf32> to vector<128xf32>
    %64 = vector.shape_cast %63 : vector<128xf32> to vector<1x128xf32>
    %65 = arith.mulf %41, %41 : vector<1x128xf32>
    %cst_25 = arith.constant 1.000000e-16 : f32
    %66 = vector.broadcast %cst_25 : f32 to vector<1x128xf32>
    %67 = arith.maximumf %65, %66 : vector<1x128xf32>
    %68 = math.sqrt %67 : vector<1x128xf32>
    %69 = arith.divf %64, %68 : vector<1x128xf32>
    %c126_i32_26 = arith.constant 126 : i32
    %70 = tpu.dynamic_rotate %1 by %c126_i32_26 dim 1 : vector<16x128xf32>, i32 -> vector<16x128xf32>
    %71 = tpu.iota {dimensions = array<i32: 1>} : vector<16x128xi32>
    %c126_i32_27 = arith.constant 126 : i32
    %72 = vector.broadcast %c126_i32_27 : i32 to vector<16x128xi32>
    %73 = arith.cmpi slt, %71, %72 : vector<16x128xi32>
    %cst_28 = arith.constant 0.000000e+00 : f32
    %74 = vector.broadcast %cst_28 : f32 to vector<16x128xf32>
    %75 = arith.select %73, %70, %74 : vector<16x128xi1>, vector<16x128xf32>
    %76 = arith.mulf %1, %75 : vector<16x128xf32>
    %cst_29 = arith.constant dense<0.000000e+00> : vector<128xf32>
    %77 = vector.multi_reduction <add>, %76, %cst_29 [0] : vector<16x128xf32> to vector<128xf32>
    %78 = vector.shape_cast %77 : vector<128xf32> to vector<1x128xf32>
    %c126_i32_30 = arith.constant 126 : i32
    %79 = tpu.dynamic_rotate %41 by %c126_i32_30 dim 1 : vector<1x128xf32>, i32 -> vector<1x128xf32>
    %80 = tpu.iota {dimensions = array<i32: 1>} : vector<1x128xi32>
    %c126_i32_31 = arith.constant 126 : i32
    %81 = vector.broadcast %c126_i32_31 : i32 to vector<1x128xi32>
    %82 = arith.cmpi slt, %80, %81 : vector<1x128xi32>
    %cst_32 = arith.constant 0.000000e+00 : f32
    %83 = vector.broadcast %cst_32 : f32 to vector<1x128xf32>
    %84 = arith.select %82, %79, %83 : vector<1x128xi1>, vector<1x128xf32>
    %85 = arith.mulf %41, %84 : vector<1x128xf32>
    %cst_33 = arith.constant 1.000000e-16 : f32
    %86 = vector.broadcast %cst_33 : f32 to vector<1x128xf32>
    %87 = arith.maximumf %85, %86 : vector<1x128xf32>
    %88 = math.sqrt %87 : vector<1x128xf32>
    %89 = arith.divf %78, %88 : vector<1x128xf32>
    %90 = tpu.concatenate %61, %69, %89 in 0 : vector<1x128xf32>, vector<1x128xf32>, vector<1x128xf32> -> vector<3x128xf32>
    %cst_34 = arith.constant dense<0xFF800000> : vector<3xf32>
    %91 = vector.multi_reduction <maximumf>, %90, %cst_34 [1] : vector<3x128xf32> to vector<3xf32>
    %92 = vector.shape_cast %91 : vector<3xf32> to vector<3x1xf32>
    %93 = vector.broadcast %92 : vector<3x1xf32> to vector<3x128xf32>
    %94 = arith.subf %90, %93 : vector<3x128xf32>
    %95 = math.exp %94 : vector<3x128xf32>
    %cst_35 = arith.constant dense<0.000000e+00> : vector<3xf32>
    %96 = vector.multi_reduction <add>, %95, %cst_35 [1] : vector<3x128xf32> to vector<3xf32>
    %97 = vector.shape_cast %96 : vector<3xf32> to vector<3x1xf32>
    %98 = vector.broadcast %97 : vector<3x1xf32> to vector<3x128xf32>
    %99 = arith.divf %95, %98 : vector<3x128xf32>
    %cst_36 = arith.constant 0.000000e+00 : f32
    %100 = vector.broadcast %cst_36 : f32 to vector<16x128xf32>
    %cst_37 = arith.constant 0.000000e+00 : f32
    %101 = vector.broadcast %cst_37 : f32 to vector<16x128xf32>
    %c2_i32_38 = arith.constant 2 : i32
    %102 = tpu.dynamic_rotate %8 by %c2_i32_38 dim 1 : vector<32x128xf32>, i32 -> vector<32x128xf32>
    %103 = tpu.iota {dimensions = array<i32: 1>} : vector<32x128xi32>
    %c2_i32_39 = arith.constant 2 : i32
    %104 = vector.broadcast %c2_i32_39 : i32 to vector<32x128xi32>
    %105 = arith.cmpi sge, %103, %104 : vector<32x128xi32>
    %cst_40 = arith.constant 0.000000e+00 : f32
    %106 = vector.broadcast %cst_40 : f32 to vector<32x128xf32>
    %107 = arith.select %105, %102, %106 : vector<32x128xi1>, vector<32x128xf32>
    %108 = vector.extract_strided_slice %99 {offsets = [0, 0], sizes = [1, 128], strides = [1, 1]} : vector<3x128xf32> to vector<1x128xf32>
    %109 = vector.extract_strided_slice %107 {offsets = [0, 0], sizes = [16, 128], strides = [1, 1]} : vector<32x128xf32> to vector<16x128xf32>
    %110 = vector.broadcast %108 : vector<1x128xf32> to vector<16x128xf32>
    %111 = arith.mulf %110, %109 : vector<16x128xf32>
    %112 = arith.addf %100, %111 : vector<16x128xf32>
    %113 = vector.extract_strided_slice %38 {offsets = [0, 0], sizes = [1, 128], strides = [1, 1]} : vector<3x128xf32> to vector<1x128xf32>
    %114 = vector.extract_strided_slice %107 {offsets = [16, 0], sizes = [16, 128], strides = [1, 1]} : vector<32x128xf32> to vector<16x128xf32>
    %115 = vector.broadcast %113 : vector<1x128xf32> to vector<16x128xf32>
    %116 = arith.mulf %115, %114 : vector<16x128xf32>
    %117 = arith.addf %101, %116 : vector<16x128xf32>
    %118 = vector.extract_strided_slice %99 {offsets = [1, 0], sizes = [1, 128], strides = [1, 1]} : vector<3x128xf32> to vector<1x128xf32>
    %119 = vector.extract_strided_slice %8 {offsets = [0, 0], sizes = [16, 128], strides = [1, 1]} : vector<32x128xf32> to vector<16x128xf32>
    %120 = vector.broadcast %118 : vector<1x128xf32> to vector<16x128xf32>
    %121 = arith.mulf %120, %119 : vector<16x128xf32>
    %122 = arith.addf %112, %121 : vector<16x128xf32>
    %123 = vector.extract_strided_slice %38 {offsets = [1, 0], sizes = [1, 128], strides = [1, 1]} : vector<3x128xf32> to vector<1x128xf32>
    %124 = vector.extract_strided_slice %8 {offsets = [16, 0], sizes = [16, 128], strides = [1, 1]} : vector<32x128xf32> to vector<16x128xf32>
    %125 = vector.broadcast %123 : vector<1x128xf32> to vector<16x128xf32>
    %126 = arith.mulf %125, %124 : vector<16x128xf32>
    %127 = arith.addf %117, %126 : vector<16x128xf32>
    %c126_i32_41 = arith.constant 126 : i32
    %128 = tpu.dynamic_rotate %8 by %c126_i32_41 dim 1 : vector<32x128xf32>, i32 -> vector<32x128xf32>
    %129 = tpu.iota {dimensions = array<i32: 1>} : vector<32x128xi32>
    %c126_i32_42 = arith.constant 126 : i32
    %130 = vector.broadcast %c126_i32_42 : i32 to vector<32x128xi32>
    %131 = arith.cmpi slt, %129, %130 : vector<32x128xi32>
    %cst_43 = arith.constant 0.000000e+00 : f32
    %132 = vector.broadcast %cst_43 : f32 to vector<32x128xf32>
    %133 = arith.select %131, %128, %132 : vector<32x128xi1>, vector<32x128xf32>
    %134 = vector.extract_strided_slice %99 {offsets = [2, 0], sizes = [1, 128], strides = [1, 1]} : vector<3x128xf32> to vector<1x128xf32>
    %135 = vector.extract_strided_slice %133 {offsets = [0, 0], sizes = [16, 128], strides = [1, 1]} : vector<32x128xf32> to vector<16x128xf32>
    %136 = vector.broadcast %134 : vector<1x128xf32> to vector<16x128xf32>
    %137 = arith.mulf %136, %135 : vector<16x128xf32>
    %138 = arith.addf %122, %137 : vector<16x128xf32>
    %139 = vector.extract_strided_slice %38 {offsets = [2, 0], sizes = [1, 128], strides = [1, 1]} : vector<3x128xf32> to vector<1x128xf32>
    %140 = vector.extract_strided_slice %133 {offsets = [16, 0], sizes = [16, 128], strides = [1, 1]} : vector<32x128xf32> to vector<16x128xf32>
    %141 = vector.broadcast %139 : vector<1x128xf32> to vector<16x128xf32>
    %142 = arith.mulf %141, %140 : vector<16x128xf32>
    %143 = arith.addf %127, %142 : vector<16x128xf32>
    %c0_44 = arith.constant 0 : index
    %c0_45 = arith.constant 0 : index
    %144 = vector.load %arg5[%c0_44, %c0_45] : memref<16x1xf32, #tpu.memory_space<vmem>>, vector<16x1xf32>
    %145 = vector.broadcast %144 : vector<16x1xf32> to vector<16x128xf32>
    %146 = arith.addf %138, %145 : vector<16x128xf32>
    %cst_46 = arith.constant 0.000000e+00 : f32
    %147 = vector.broadcast %cst_46 : f32 to vector<16x128xf32>
    %148 = arith.maximumf %146, %147 : vector<16x128xf32>
    %c0_47 = arith.constant 0 : index
    %c0_48 = arith.constant 0 : index
    %149 = vector.load %arg6[%c0_47, %c0_48] : memref<16x1xf32, #tpu.memory_space<vmem>>, vector<16x1xf32>
    %150 = vector.broadcast %149 : vector<16x1xf32> to vector<16x128xf32>
    %151 = arith.addf %143, %150 : vector<16x128xf32>
    %cst_49 = arith.constant 0.000000e+00 : f32
    %152 = vector.broadcast %cst_49 : f32 to vector<16x128xf32>
    %153 = arith.maximumf %151, %152 : vector<16x128xf32>
    %c0_50 = arith.constant 0 : index
    %c0_51 = arith.constant 0 : index
    %154 = vector.load %arg7[%c0_50, %c0_51] : memref<16x16xf32, #tpu.memory_space<vmem>>, vector<16x16xf32>
    %155 = arith.addf %148, %153 : vector<16x128xf32>
    %156 = arith.truncf %154 : vector<16x16xf32> to vector<16x16xbf16>
    %157 = arith.truncf %155 : vector<16x128xf32> to vector<16x128xbf16>
    %cst_52 = arith.constant dense<0.000000e+00> : vector<16x128xf32>
    %158 = tpu.matmul %156, %157, %cst_52 {dimension_numbers = #tpu.dot_dimension_numbers<[1], [0], [0], [1], [0, 0, 1, 1], [], []>} : vector<16x16xbf16>, vector<16x128xbf16>, vector<16x128xf32> -> vector<16x128xf32>
    %c0_53 = arith.constant 0 : index
    %c0_54 = arith.constant 0 : index
    %159 = vector.load %arg8[%c0_53, %c0_54] : memref<16x1xf32, #tpu.memory_space<vmem>>, vector<16x1xf32>
    %160 = vector.broadcast %159 : vector<16x1xf32> to vector<16x128xf32>
    %161 = arith.addf %158, %160 : vector<16x128xf32>
    %162 = arith.addf %1, %161 : vector<16x128xf32>
    %163 = vector.broadcast %3 : vector<1x128xf32> to vector<16x128xf32>
    %164 = arith.mulf %162, %163 : vector<16x128xf32>
    %c0_55 = arith.constant 0 : index
    %c0_56 = arith.constant 0 : index
    %c0_57 = arith.constant 0 : index
    %165 = vector.load %arg9[%c0_55, %c0_56, %c0_57] : memref<1x16x128xf32, #tpu.memory_space<vmem>>, vector<1x16x128xf32>
    %166 = vector.shape_cast %165 : vector<1x16x128xf32> to vector<16x128xf32>
    %167 = vector.shape_cast %164 : vector<16x128xf32> to vector<1x16x128xf32>
    tpu.vector_store %arg9[%c0_55, %c0_56, %c0_57], %167 {strides = array<i32>} : memref<1x16x128xf32, #tpu.memory_space<vmem>>, vector<1x16x128xf32>,
    return
  }
  func.func @transform_0(%arg0: i32) -> (i32, i32, i32) {
    %c0_i32 = arith.constant 0 : i32
    %c0_i32_0 = arith.constant 0 : i32
    %c0_i32_1 = arith.constant 0 : i32
    return %arg0, %c0_i32, %c0_i32_0 : i32, i32, i32
  }
  func.func @transform_1(%arg0: i32) -> (i32, i32, i32) {
    %c0_i32 = arith.constant 0 : i32
    %c0_i32_0 = arith.constant 0 : i32
    %c0_i32_1 = arith.constant 0 : i32
    return %arg0, %c0_i32, %c0_i32_0 : i32, i32, i32
  }
  func.func @transform_2(%arg0: i32) -> (i32, i32) {
    %c0_i32 = arith.constant 0 : i32
    %c0_i32_0 = arith.constant 0 : i32
    %c0_i32_1 = arith.constant 0 : i32
    return %c0_i32, %c0_i32_0 : i32, i32
  }
  func.func @transform_3(%arg0: i32) -> (i32, i32) {
    %c0_i32 = arith.constant 0 : i32
    %c0_i32_0 = arith.constant 0 : i32
    %c0_i32_1 = arith.constant 0 : i32
    return %c0_i32, %c0_i32_0 : i32, i32
  }
  func.func @transform_4(%arg0: i32) -> (i32, i32) {
    %c0_i32 = arith.constant 0 : i32
    %c0_i32_0 = arith.constant 0 : i32
    %c0_i32_1 = arith.constant 0 : i32
    return %c0_i32, %c0_i32_0 : i32, i32
  }
  func.func @transform_5(%arg0: i32) -> (i32, i32) {
    %c0_i32 = arith.constant 0 : i32
    %c0_i32_0 = arith.constant 0 : i32
    %c0_i32_1 = arith.constant 0 : i32
    return %c0_i32, %c0_i32_0 : i32, i32
  }
  func.func @transform_6(%arg0: i32) -> (i32, i32) {
    %c0_i32 = arith.constant 0 : i32
    %c0_i32_0 = arith.constant 0 : i32
    %c0_i32_1 = arith.constant 0 : i32
    return %c0_i32, %c0_i32_0 : i32, i32
  }
  func.func @transform_7(%arg0: i32) -> (i32, i32) {
    %c0_i32 = arith.constant 0 : i32
    %c0_i32_0 = arith.constant 0 : i32
    %c0_i32_1 = arith.constant 0 : i32
    return %c0_i32, %c0_i32_0 : i32, i32
  }
  func.func @transform_8(%arg0: i32) -> (i32, i32, i32) {
    %c0_i32 = arith.constant 0 : i32
    %c0_i32_0 = arith.constant 0 : i32
    %c0_i32_1 = arith.constant 0 : i32
    return %arg0, %c0_i32, %c0_i32_0 : i32, i32, i32
  }
}

</mosaic_0001>

<bundles_post_ra>
// kernel: tpu_custom_call.1
= control target key start
LH: loop header
LB: loop body
LE: loop exit
PB: predicated region body
PF: predicated region fallthrough
CT: control target
= control target key end

     0   :  { %13 = vsyncpa [#allocation3], 0  ;;  %s1388_s0 = inlined_call_operand.vmem [shape: f32[2,16,128], index: 0, kind: input, shape index: {}]   ;;  %s1389_s1 = inlined_call_operand.vmem [shape: f32[2,1,128], index: 1, kind: input, shape index: {}]   ;;  %s1390_s2 = inlined_call_operand.vmem [shape: f32[80,16], index: 2, kind: input, shape index: {}]   ;;  %s1391_s3 = inlined_call_operand.vmem [shape: f32[9,1], index: 3, kind: input, shape index: {}]   ;;  %s1392_s4 = inlined_call_operand.vmem [shape: f32[16,1], index: 4, kind: input, shape index: {}]   ;;  %s1393_s5 = inlined_call_operand.vmem [shape: f32[16,1], index: 5, kind: input, shape index: {}]   ;;  %s1394_s6 = inlined_call_operand.vmem [shape: f32[16,16], index: 6, kind: input, shape index: {}]   ;;  %s1395_s7 = inlined_call_operand.vmem [shape: f32[16,1], index: 7, kind: input, shape index: {}]   ;;  %s1396_s8 = inlined_call_operand.hbm [shape: f32[2,16,128], index: 8, kind: output, shape index: {}]  }
   0x1   :  { %15 = vsyncpa [#allocation3 + $0x1], 0  ;;  %s1089_s27 = smov 0   ;;  %s1091_s28 = smov 0  }
   0x2   :  { %s1093_s29 = smov 0   ;;  %s1095_s30 = smov 0  }
   0x3 LB: > { %s1110_s9 = sadd.s32 4294967295, %s1034_s30   ;;  %s845_s10 = sadd.s32 4294967294, %s1034_s30   ;;  %s1034_s30 = sphi %s1095_s30, %s1402_s30   ;;  %s1030_s29 = sphi %s1093_s29, %s1401_s29   ;;  %s1026_s28 = sphi %s1091_s28, %s1400_s28   ;;  %s1022_s27 = sphi %s1089_s27, %s1399_s27  }
   0x4   : > { %s1114_s11 = sadd.s32 1, %s1034_s30   ;;  %s206_s12 = sadd.s32 1, %s1030_s29 }
   0x5   : > { %s203_s13 = ssub.s32 %s1034_s30, %s1114_s11  ;;  %p216_p0 = scmp.ne.s32.totalorder %s1030_s29, %s1026_s28 }
   0x6   : > { %p204_p1 = scmp.eq.s32.totalorder %s203_s13, 0  ;;  %p217_p2 = scmp.eq.s32.totalorder %s1110_s9, 1 }
   0x7   : > { %p222_p3 = scmp.ne.s32.totalorder %s1026_s28, %s1022_s27  ;;  %p223_p4 = scmp.eq.s32.totalorder %s845_s10, 1 }
   0x8   : > { %s1125_s14 = scalar_select %p204_p1, %s1030_s29, %s206_s12  }
   0x9   : > { %p1127_p5 = por %p217_p2, %p216_p0  ;;  %p1131_p6 = por %p223_p4, %p222_p3 }
   0xa   : > { %p848_p7 = scmp.ge.s32.totalorder %s1034_s30, 1  ;;  %p273_p8 = scmp.lt.s32.totalorder %s1034_s30, 3 }
   0xc   : > { %p274_p9 = pnand %p848_p7, %p273_p8 }
   0xd   : > { %p310_p10 = scmp.lt.s32.totalorder (!%p274_p9), %s1110_s9, 1  ;;  %s1039_s10 = smov (!%p274_p9), 2  }
   0xe   : > { %277 = sbr.rel (%p274_p9) target bundleno = 748 (0x2ec), region = 52  ;;  %s307_s19 = sand.u32 (!%p274_p9), 1, %s1026_s28  }
   0xf   : > { %s865_s24 = sshll.u32 (!%p274_p9), %s1110_s9, 8  ;;  %s1348_s12 = scalar_lea.sflag (!%p274_p9), [#allocation3], %s307_s19 }
  0x10   : > { %s1346_s26 = scalar_lea.hbm (!%p274_p9), %s1396_s8, %s865_s24 }
  0x13   : > { %v1036_v0 = vmov 0.0   ;;  %s1139_s17 = scalar_select %p310_p10, %s1110_s9, 1  ;;  %vm1037_vm0 = vmmov 0   ;;  %v322_v1 = vld [vmem:[%s1390_s2] sm:$0xff]  ;;  %v323_v2 = vld [vmem:[%s1390_s2 + $0x8] sm:$0xff]  ;;  %v328_v3 = vld [vmem:[%s1390_s2 + $0x30] sm:$0xff]  ;;  %v431_v31 = vlaneseq }
  0x14   : > { %874 = vmatprep.subr.bf16.mxu0 %v1036_v0  ;;  %902 = vmatprep.subr.bf16.mxu1 %v1036_v0  ;;  %v329_v4 = vld [vmem:[%s1390_s2 + $0x38] sm:$0xff]  ;;  %v332_v10 = vpack.c.bf16 %v323_v2, %v322_v1  ;;  %vm338_vm1 = vcmask 130048   ;;  %v324_v14 = vld [vmem:[%s1390_s2 + $0x10] sm:$0xff]  ;;  %v330_v16 = vld [vmem:[%s1390_s2 + $0x40] sm:$0xff]  ;;  %v1040_v29 = vmov 0   ;;  %vm461_vm10 = vcmask 1040384  }
  0x15   : > { %876 = vmatprep.mubr.msk.bf16.mxu0 %vm1037_vm0, %v1036_v0  ;;  %888 = vmatprep.mubr.msk.bf16.mxu1 %vm1037_vm0, %v1036_v0  ;;  %s864_s18 = sshll.u32 %s1139_s17, 4  ;;  %v335_v11 = vpack.c.bf16 %v329_v4, %v328_v3  ;;  %v325_v15 = vld [vmem:[%s1390_s2 + $0x18] sm:$0xff]  ;;  %v331_v17 = vld [vmem:[%s1390_s2 + $0x48] sm:$0xff]  ;;  %v326_v25 = vld [vmem:[%s1390_s2 + $0x20] sm:$0xff]  ;;  %v1219_v33 = vand.u32 127, %v431_v31  ;;  %vm568_vm11 = vcmask 1041408  }
  0x16   : > { %s314_s23 = scalar_lea.vmem %s1388_s0, %s864_s18  ;;  %s1038_s18 = smov 126   ;;  %v333_v20 = vpack.c.bf16 %v325_v15, %v324_v14  ;;  %v336_v21 = vpack.c.bf16 %v331_v17, %v330_v16  ;;  %v327_v26 = vld [vmem:[%s1390_s2 + $0x28] sm:$0xff]  ;;  %950 = vset.pattern.permute.xlu1 %v1040_v29  ;;  %951 = vset.pattern.permute.xlu0 %v1040_v29  ;;  %v447_v30 = vld [vmem:[%s1391_s3] sm:$0xff]  ;;  %vm570_vm12 = vcmask 1042432  }
  0x17   : > { %v1159_v5 = vld [vmem:[%s314_s23] sm:$0xff]  ;;  %v1161_v6 = vld [vmem:[%s314_s23 + $0x8] sm:$0xff]  ;;  %v334_v27 = vpack.c.bf16 %v327_v26, %v326_v25  ;;  %vm442_vm2 = vcmp.lt.s32.totalorder %v1219_v33, 126  ;;  %vm433_vm3 = vcmp.ge.s32.totalorder %v1219_v33, 2  ;;  %s1041_s9 = smov [#allocation2]  }
  0x18   : > { %v337_v7 = vpack.c.bf16 %v1161_v6, %v1159_v5  ;;  %v486_v8 = vmul.f32 %v1159_v5, %v1159_v5  ;;  %v487_v9 = vmul.f32 %v1161_v6, %v1161_v6  ;;  %535 = vrot.lane.b32.xlu1 %v1159_v5, %s1038_s18  ;;  %v448_v28 = vld [vmem:[%s1391_s3 + $0x8] sm:$0x1]  ;;  %s978_s20 = sshll.u32 %s1041_s9, 4  ;;  %s979_s20 = int_to_ptr.vmem [resolvable:$false] %s978_s20 }
  0x19   : > { %s980_s21 = scalar_lea.vmem %s979_s20, 512 }
  0x1a   : > { %875 = vmatpush3.bf16.msra.mxu0 %v337_v7  ;;  %903 = vmatpush3.bf16.msra.mxu1 %v337_v7  ;;  %v488_v12 = vadd.f32 %v487_v9, %v486_v8 }
  0x1b   : > { %896 = vmatprep.subr.bf16.mxu1 %v1036_v0 }
  0x1c   : > { %v489_v13 = vrot.slane %v488_v12, 4  ;;  %537 = vrot.lane.b32.xlu1 %v1161_v6, %s1038_s18 }
  0x1d   : > { %877 = vmatmul.mubr.msk.bf16.vlgmr.msra.gmra.mxu0 %vm338_vm1, %v332_v10  ;;  %889 = vmatmul.mubr.msk.bf16.vlgmr.msra.gmra.mxu1 %vm338_vm1, %v335_v11 }
  0x1e   : > { %880 = vmatprep.mubr.msk.bf16.mxu0 %vm1037_vm0, %v1036_v0  ;;  %892 = vmatprep.mubr.msk.bf16.mxu1 %vm1037_vm0, %v1036_v0  ;;  %v490_v18 = vadd.f32 %v489_v13, %v488_v12 }
  0x20   : > { %v491_v19 = vrot.slane %v490_v18, 2  ;;  %497 = vrot.lane.b32.xlu1 %v1161_v6, %s1039_s10 }
  0x22   : > { %v492_v22 = vadd.f32 %v491_v19, %v490_v18 }
  0x24   : > { %v493_v23 = vrot.slane %v492_v22, 1  ;;  %456 = vperm.xlu1 %950, %v448_v28  }
  0x25   : > { %881 = vmatmul.mubr.msk.bf16.gmra.mxu0 %vm338_vm1, %v333_v20  ;;  %893 = vmatmul.mubr.msk.bf16.gmra.mxu1 %vm338_vm1, %v336_v21 }
  0x26   : > { %v1193_v24 = vadd.f32 %v493_v23, %v492_v22  ;;  %884 = vmatprep.mubr.msk.bf16.mxu0 %vm1037_vm0, %v1036_v0  ;;  %898 = vmatprep.mubr.msk.bf16.mxu1 %vm1037_vm0, %v1036_v0 }
  0x28   : > { %550 = vrot.lane.b32.xlu0 %v1193_v24, %s1038_s18  ;;  %451 = vperm.xlu1 %950, %v447_v30   ;;  %v524_v32 = vmul.f32 %v1193_v24, %v1193_v24 }
  0x2a   : > { %v525_v34 = vmax.f32 %v524_v32, 1e-16 }
  0x2c   : > { %510 = vrot.lane.b32.xlu0 %v1193_v24, %s1039_s10  ;;  %952 = vrsqrt.f32 %v525_v34  ;;  %vm528_vm4 = vcmp.eq.f32.partialorder %v525_v34, inf  ;;  %v531_v60 = vand.u32 2147483648, %v525_v34  ;;  %vm530_vm5 = vcmp.eq.f32.partialorder %v525_v34, 0.0 }
  0x2d   : > { %885 = vmatmul.mubr.msk.bf16.gmra.mxu0 %vm338_vm1, %v334_v27 }
  0x30   : > { %495 = vrot.lane.b32.xlu0 %v1159_v5, %s1039_s10 }
  0x39   : > { %v953_v53 = vpop.eup %952 }
  0x3a   : > { %v527_v57 = vmul.f32 %v953_v53, %v525_v34 }
  0x3c   : > { %v529_v62 = vsel %vm528_vm4, %v525_v34, %v527_v57  ;;  %v693_v57 = vld [vmem:[%s1395_s7 + $0x8] sm:$0xff] }
  0x3d   : > { %v532_v4 = vsel %vm530_vm5, %v531_v60, %v529_v62 }
  0x8a   : > { %v536_v35 = vpop.permute.xlu1 %535 }
  0x8b   : > { %v539_v44 = vsel %vm442_vm2, %v536_v35, 0.0 }
  0x8c   : > { %v541_v49 = vmul.f32 %v539_v44, %v1159_v5 }
  0x8e   : > { %v538_v39 = vpop.permute.xlu1 %537 }
  0x8f   : > { %v540_v45 = vsel %vm442_vm2, %v538_v39, 0.0 }
  0x90   : > { %v542_v50 = vmul.f32 %v540_v45, %v1161_v6 }
  0x92   : > { %v498_v46 = vpop.permute.xlu1 %497  ;;  %v543_v56 = vadd.f32 %v542_v50, %v541_v49 }
  0x93   : > { %v500_v51 = vsel %vm433_vm3, %v498_v46, 0.0 }
  0x94   : > { %v502_v54 = vmul.f32 %v500_v51, %v1161_v6  ;;  %v544_v59 = vrot.slane %v543_v56, 4 }
  0x96   : > { %v545_v3 = vadd.f32 %v544_v59, %v543_v56  ;;  %v671_v56 = vld [vmem:[%s1393_s5 + $0x8] sm:$0xff] }
  0x98   : > { %v546_v12 = vrot.slane %v545_v3, 2 }
  0x9a   : > { %v551_v36 = vpop.permute.xlu0 %550  ;;  %v547_v16 = vadd.f32 %v546_v12, %v545_v3  ;;  %v670_v3 = vld [vmem:[%s1393_s5] sm:$0xff] }
  0x9b   : > { %v552_v37 = vsel %vm442_vm2, %v551_v36, 0.0 }
  0x9c   : > { %v553_v38 = vmul.f32 %v552_v37, %v1193_v24  ;;  %v548_v18 = vrot.slane %v547_v16, 1 }
  0x9e   : > { %v554_v40 = vmax.f32 %v553_v38, 1e-16  ;;  %v511_v41 = vpop.permute.xlu0 %510  ;;  %v549_v22 = vadd.f32 %v548_v18, %v547_v16 }
  0x9f   : > { %v512_v42 = vsel %vm433_vm3, %v511_v41, 0.0 }
  0xa0   : > { %954 = vrsqrt.f32 %v554_v40  ;;  %v513_v43 = vmul.f32 %v512_v42, %v1193_v24  ;;  %vm557_vm6 = vcmp.eq.f32.partialorder %v554_v40, inf  ;;  %v560_v0 = vand.u32 2147483648, %v554_v40 }
  0xa1   : > { %vm559_vm7 = vcmp.eq.f32.partialorder %v554_v40, 0.0 }
  0xa2   : > { %v496_v47 = vpop.permute.xlu0 %495  ;;  %v514_v48 = vmax.f32 %v513_v43, 1e-16 }
  0xa3   : > { %v499_v52 = vsel %vm433_vm3, %v496_v47, 0.0 }
  0xa4   : > { %956 = vrsqrt.f32 %v514_v48  ;;  %v501_v55 = vmul.f32 %v499_v52, %v1159_v5  ;;  %vm517_vm8 = vcmp.eq.f32.partialorder %v514_v48, inf  ;;  %v520_v11 = vand.u32 2147483648, %v514_v48 }
  0xa5   : > { %vm519_vm9 = vcmp.eq.f32.partialorder %v514_v48, 0.0 }
  0xa6   : > { %v503_v58 = vadd.f32 %v502_v54, %v501_v55  ;;  %v654_v54 = vld [vmem:[%s1392_s4] sm:$0xff]  ;;  %v655_v55 = vld [vmem:[%s1392_s4 + $0x8] sm:$0xff] }
  0xa8   : > { %v504_v1 = vrot.slane %v503_v58, 4 }
  0xaa   : > { %v505_v10 = vadd.f32 %v504_v1, %v503_v58 }
  0xac   : > { %v506_v15 = vrot.slane %v505_v10, 2 }
  0xad   : > { %v955_v61 = vpop.eup %954 }
  0xae   : > { %v556_v63 = vmul.f32 %v955_v61, %v554_v40  ;;  %v507_v17 = vadd.f32 %v506_v15, %v505_v10  ;;  %v457_v61 = vpop.permute.xlu1 %456 }
  0xb0   : > { %v558_v2 = vsel %vm557_vm6, %v554_v40, %v556_v63  ;;  %v508_v20 = vrot.slane %v507_v17, 1 }
  0xb1   : > { %v561_v7 = vsel %vm559_vm7, %v560_v0, %v558_v2  ;;  %v957_v8 = vpop.eup %956 }
  0xb2   : > { %958 = vrcp.f32 %v561_v7  ;;  %v516_v9 = vmul.f32 %v957_v8, %v514_v48  ;;  %v509_v25 = vadd.f32 %v508_v20, %v507_v17  ;;  %v452_v0 = vpop.permute.xlu1 %451 }
  0xb3   : > { %960 = vrcp.f32 %v532_v4  ;;  %v692_v4 = vld [vmem:[%s1395_s7] sm:$0xff] }
  0xb4   : > { %v518_v13 = vsel %vm517_vm8, %v514_v48, %v516_v9 }
  0xb5   : > { %v521_v14 = vsel %vm519_vm9, %v520_v11, %v518_v13 }
  0xb6   : > { %962 = vrcp.f32 %v521_v14 }
  0xbf   : > { %v959_v19 = vpop.eup %958 }
  0xc0   : > { %v961_v21 = vpop.eup %960  ;;  %v563_v23 = vmul.f32 %v959_v19, %v549_v22 }
  0xc1   : > { %v534_v26 = vmul.f32 %v961_v21, %v1193_v24 }
  0xc2   : > { %v565_v29 = vrot.slane %v563_v23, 6 }
  0xc3   : > { %v963_v27 = vpop.eup %962 }
  0xc4   : > { %v523_v28 = vmul.f32 %v963_v27, %v509_v25 }
  0xc6   : > { %v567_v30 = vsel %vm461_vm10, %v523_v28, %v534_v26 }
  0xc7   : > { %v569_v32 = vsel %vm568_vm11, %v567_v30, %v565_v29 }
  0xc8   : > { %v571_v34 = vsel %vm570_vm12, %v569_v32, -inf }
  0xc9   : > { %572 = vmax.xlane.f32.xlu0 %v571_v34 }
  0xdd   : > { %v1244_v35 = vpop.f32.mrf.mxu0  ;;  %v412_v36 = vpop.f32.mrf.mxu1 }
  0xdf   : > { %v878_v37 = vpop.f32.mrf.mxu0  ;;  %v890_v38 = vpop.f32.mrf.mxu1  ;;  %582 = vrot.lane.b32.xlu0 %v1244_v35, %s1039_s10 }
  0xe1   : > { %v1248_v24 = vpop.f32.mrf.mxu0  ;;  %v415_v39 = vpop.f32.mrf.mxu1 }
  0xe3   : > { %v879_v40 = vpop.f32.mrf.mxu0  ;;  %v891_v41 = vpop.f32.mrf.mxu1  ;;  %584 = vrot.lane.b32.xlu0 %v1248_v24, %s1039_s10 }
  0xe5   : > { %v1252_v42 = vpop.f32.mrf.mxu0  ;;  %v420_v43 = vpop.f32.mrf.mxu1 }
  0xe7   : > { %v882_v44 = vpop.f32.mrf.mxu0  ;;  %v894_v45 = vpop.f32.mrf.mxu1  ;;  %586 = vrot.lane.b32.xlu0 %v1252_v42, %s1039_s10 }
  0xe9   : > { %v1256_v46 = vpop.f32.mrf.mxu0  ;;  %v423_v47 = vpop.f32.mrf.mxu1 }
  0xea   : > { %440 = vrot.lane.b32.xlu1 %v423_v47, %s1038_s18 }
  0xeb   : > { %v883_v48 = vpop.f32.mrf.mxu0  ;;  %v895_v49 = vpop.f32.mrf.mxu1  ;;  %626 = vrot.lane.b32.xlu0 %v1244_v35, %s1038_s18 }
  0xed   : > { %v404_v50 = vpop.f32.mrf.mxu0 }
  0xee   : > { %427 = vrot.lane.b32.xlu1 %v404_v50, %s1039_s10 }
  0xef   : > { %v886_v51 = vpop.f32.mrf.mxu0  ;;  %628 = vrot.lane.b32.xlu0 %v1248_v24, %s1038_s18 }
  0xf1   : > { %v407_v52 = vpop.f32.mrf.mxu0 }
  0xf2   : > { %429 = vrot.lane.b32.xlu1 %v407_v52, %s1039_s10 }
  0xf3   : > { %v887_v53 = vpop.f32.mrf.mxu0  ;;  %630 = vrot.lane.b32.xlu0 %v1252_v42, %s1038_s18 }
  0xf4   : > { %v595_v53 = vshrl.u32 %v431_v31, 7 }
  0xf6   : > { %438 = vrot.lane.b32.xlu1 %v420_v43, %s1038_s18 }
  0xf7   : > { %632 = vrot.lane.b32.xlu0 %v1256_v46, %s1038_s18  ;;  %s317_s18 = scalar_lea.vmem %s1389_s1, %s1139_s17 }
  0xfa   : > { %588 = vrot.lane.b32.xlu1 %v1256_v46, %s1039_s10  ;;  %s849_s10 = sshll.u32 %s307_s19, 4 }
  0xfb   : > { %658 = vperm.xlu0 %951, %v654_v54   ;;  %s309_s22 = scalar_lea.vmem [#allocation2], %s849_s10 }
  0xfc   : > { %s774_s23 = sshll.u32 %s309_s22, 4  ;;  %s1341_s23 = int_to_ptr.vmem [resolvable:$true] %s774_s23 }
  0xfd   : > { %s974_s13 = scalar_lea.vmem %s1341_s23, 256  ;;  %p981_p0 = scmp.lt.s32.totalorder %s1341_s23, %s979_s20 }
  0xfe   : > { %663 = vperm.xlu1 %950, %v655_v55   ;;  %p975_p11 = scmp.ne.s32.totalorder %s1341_s23, %s974_s13  ;;  %p982_p1 = scmp.lt.s32.totalorder %s980_s21, %s974_s13 }
  0xff   : > { %679 = vperm.xlu0 %951, %v671_v56  }
 0x100   : > { %p976_p12 = pnand %p975_p11, %p1127_p5  ;;  %p983_p2 = por %p982_p1, %p981_p0 }
 0x102   : > { %p977_p13 = pneg %p976_p12 }
 0x103   : > { %701 = vperm.xlu0 %951, %v693_v57   ;;  %v604_v57 = vsub.s32 3, %v595_v53 }
 0x104   : > { %p984_p3 = pnand %p983_p2, %p977_p13 }
 0x152   : > { %v573_v58 = vpop.xlane.xlu0 %572 }
 0x153   : > { %v574_v59 = vsub.f32 %v569_v32, %v573_v58  ;;  %v620_v58 = vsub.s32 4, %v595_v53 }
 0x155   : > { %v575_v60 = vmul.f32 1.442695, %v574_v59 }
 0x156   : > { %v583_v43 = vpop.permute.xlu0 %582 }
 0x157   : > { %964 = vpow2.f32 %v575_v60 }
 0x15a   : > { %v585_v47 = vpop.permute.xlu0 %584 }
 0x15c   : > { %v441_v1 = vpop.permute.xlu1 %440 }
 0x15d   : > { %v444_v10 = vsel %vm442_vm2, %v441_v1, 0.0 }
 0x15e   : > { %v587_v49 = vpop.permute.xlu0 %586 }
 0x15f   : > { %v592_v31 = vsel %vm433_vm3, %v587_v49, 0.0 }
 0x160   : > { %v428_v2 = vpop.permute.xlu1 %427 }
 0x161   : > { %v434_v12 = vsel %vm433_vm3, %v428_v2, 0.0 }
 0x162   : > { %v436_v15 = vadd.f32 %v434_v12, %v412_v36  ;;  %v627_v51 = vpop.permute.xlu0 %626  ;;  %v640_v12 = vsub.s32 2, %v595_v53 }
 0x164   : > { %v1284_v62 = vpop.eup %964  ;;  %v430_v7 = vpop.permute.xlu1 %429 }
 0x165   : > { %v577_v63 = vsel %vm570_vm12, %v1284_v62, 0.0  ;;  %v435_v8 = vsel %vm433_vm3, %v430_v7, 0.0 }
 0x166   : > { %578 = vadd.xlane.f32.xlu1 %v577_v63  ;;  %v437_v9 = vadd.f32 %v435_v8, %v415_v39  ;;  %v629_v54 = vpop.permute.xlu0 %628 }
 0x168   : > { %v439_v11 = vpop.permute.xlu1 %438  ;;  %v446_v13 = vadd.f32 %v444_v10, %v437_v9  ;;  %v596_v10 = vsub.s32 0, %v595_v53 }
 0x169   : > { %v443_v14 = vsel %vm442_vm2, %v439_v11, 0.0  ;;  %v612_v11 = vsub.s32 1, %v595_v53 }
 0x16a   : > { %v445_v16 = vadd.f32 %v443_v14, %v436_v15  ;;  %v460_v17 = vadd.f32 %v457_v61, %v446_v13  ;;  %v631_v60 = vpop.permute.xlu0 %630 }
 0x16c   : > { %v459_v18 = vadd.f32 %v452_v0, %v445_v16  ;;  %v462_v19 = vsel %vm461_vm10, %v460_v17, -inf  ;;  %v589_v50 = vpop.permute.xlu1 %588  ;;  %v648_v0 = vsub.s32 5, %v595_v53 }
 0x16d   : > { %v593_v1 = vsel %vm433_vm3, %v589_v50, 0.0 }
 0x16e   : > { %v463_v20 = vmax.f32 %v459_v18, %v462_v19  ;;  %v633_v2 = vpop.permute.xlu0 %632  ;;  %v636_v19 = vsel %vm442_vm2, %v631_v60, 0.0  ;;  %v858_v60 = vld [vmem:[%s317_s18] ss:$0 sm:$0xff] }
 0x16f   : > { %v637_v16 = vsel %vm442_vm2, %v633_v2, 0.0 }
 0x170   : > { %v464_v21 = vrot.slane %v463_v20, 4 }
 0x172   : > { %v465_v22 = vmax.f32 %v463_v20, %v464_v21 }
 0x174   : > { %v466_v23 = vrot.slane %v465_v22, 2 }
 0x176   : > { %v467_v25 = vmax.f32 %v465_v22, %v466_v23  ;;  %v659_v15 = vpop.permute.xlu0 %658  ;;  %v590_v22 = vsel %vm433_vm3, %v583_v43, 0.0  ;;  %v591_v23 = vsel %vm433_vm3, %v585_v47, 0.0 }
 0x177   : > { %674 = vperm.xlu1 %950, %v670_v3  }
 0x178   : > { %v468_v26 = vrot.slane %v467_v25, 1 }
 0x179   : > { %v664_v52 = vpop.permute.xlu1 %663 }
 0x17a   : > { %v469_v27 = vmax.f32 %v467_v25, %v468_v26 }
 0x17b   : > { %696 = vperm.xlu1 %950, %v692_v4  }
 0x17c   : > { %v471_v28 = vsub.f32 %v460_v17, %v469_v27  ;;  %v470_v29 = vsub.f32 %v459_v18, %v469_v27 }
 0x17e   : > { %v474_v30 = vmul.f32 1.442695, %v471_v28  ;;  %v472_v32 = vmul.f32 1.442695, %v470_v29 }
 0x180   : > { %966 = vpow2.f32 %v474_v30  ;;  %v634_v30 = vsel %vm442_vm2, %v627_v51, 0.0 }
 0x181   : > { %968 = vpow2.f32 %v472_v32  ;;  %v635_v32 = vsel %vm442_vm2, %v629_v54, 0.0  ;;  %v686_v54 = vld [vmem:[%s1394_s6] sm:$0xff] }
 0x18d   : > { %v967_v34 = vpop.eup %966 }
 0x18e   : > { %v969_v36 = vpop.eup %968  ;;  %v476_v37 = vsel %vm461_vm10, %v967_v34, 0.0  ;;  %v680_v34 = vpop.permute.xlu0 %679 }
 0x18f   : > { %v477_v38 = vadd.f32 %v969_v36, %v476_v37 }
 0x191   : > { %v478_v39 = vrot.slane %v477_v38, 4 }
 0x193   : > { %v479_v40 = vadd.f32 %v478_v39, %v477_v38 }
 0x195   : > { %v480_v41 = vrot.slane %v479_v40, 2 }
 0x197   : > { %v481_v44 = vadd.f32 %v480_v41, %v479_v40 }
 0x199   : > { %v482_v45 = vrot.slane %v481_v44, 1 }
 0x19b   : > { %v483_v48 = vadd.f32 %v482_v45, %v481_v44 }
 0x19d   : > { %970 = vrcp.f32 %v483_v48 }
 0x1aa   : > { %v971_v55 = vpop.eup %970 }
 0x1ab   : > { %v485_v59 = vmul.f32 %v971_v55, %v969_v36  ;;  %v687_v55 = vld [vmem:[%s1394_s6 + $0x8] sm:$0xff] }
 0x1ad   : > { %v605_v61 = vrot.slane %v485_v59, %v604_v57  ;;  %v621_v63 = vrot.slane %v485_v59, %v620_v58  ;;  %v649_v9 = vrot.slane %v485_v59, %v648_v0  ;;  %v690_v57 = vpack.c.bf16 %v687_v55, %v686_v54  ;;  %v702_v0 = vpop.permute.xlu0 %701 }
 0x1af   : > { %v623_v3 = vmul.f32 %v621_v63, %v1256_v46  ;;  %v607_v4 = vmul.f32 %v605_v61, %v593_v1  ;;  %v606_v7 = vmul.f32 %v605_v61, %v592_v31  ;;  %v622_v8 = vmul.f32 %v621_v63, %v1252_v42 }
 0x1b0   : > { %v651_v18 = vmul.f32 %v649_v9, %v637_v16  ;;  %v650_v25 = vmul.f32 %v649_v9, %v636_v19 }
 0x1b1   : > { %v625_v14 = vadd.f32 %v623_v3, %v607_v4  ;;  %v624_v46 = vadd.f32 %v622_v8, %v606_v7 }
 0x1b3   : > { %v653_v26 = vadd.f32 %v651_v18, %v625_v14  ;;  %v652_v36 = vadd.f32 %v650_v25, %v624_v46 }
 0x1b5   : > { %v683_v43 = vadd.f32 %v680_v34, %v653_v26 }
 0x1b7   : > { %v685_v48 = vmax.f32 %v683_v43, 0.0 }
 0x1ef   : > { %v579_v56 = vpop.xlane.xlu1 %578 }
 0x1f0   : > { %972 = vrcp.f32 %v579_v56 }
 0x1f3   : > { %v675_v37 = vpop.permute.xlu1 %674 }
 0x1fd   : > { %v973_v13 = vpop.eup %972 }
 0x1fe   : > { %v581_v17 = vmul.f32 %v973_v13, %v1284_v62 }
 0x200   : > { %v597_v20 = vrot.slane %v581_v17, %v596_v10  ;;  %v613_v21 = vrot.slane %v581_v17, %v612_v11  ;;  %v641_v42 = vrot.slane %v581_v17, %v640_v12 }
 0x202   : > { %v598_v27 = vmul.f32 %v597_v20, %v590_v22  ;;  %v599_v28 = vmul.f32 %v597_v20, %v591_v23  ;;  %v614_v62 = vmul.f32 %v613_v21, %v1244_v35  ;;  %v615_v29 = vmul.f32 %v613_v21, %v1248_v24 }
 0x203   : > { %v642_v40 = vmul.f32 %v641_v42, %v634_v30  ;;  %v643_v41 = vmul.f32 %v641_v42, %v635_v32  ;;  %v682_v35 = vadd.f32 %v675_v37, %v652_v36 }
 0x204   : > { %v616_v38 = vadd.f32 %v614_v62, %v598_v27  ;;  %v617_v39 = vadd.f32 %v615_v29, %v599_v28 }
 0x205   : > { %v684_v33 = vmax.f32 %v682_v35, 0.0 }
 0x206   : > { %v644_v44 = vadd.f32 %v642_v40, %v616_v38  ;;  %v645_v45 = vadd.f32 %v643_v41, %v617_v39 }
 0x208   : > { %v666_v24 = vadd.f32 %v659_v15, %v644_v44  ;;  %v667_v47 = vadd.f32 %v664_v52, %v645_v45  ;;  %v697_v52 = vpop.permute.xlu1 %696 }
 0x20a   : > { %v668_v49 = vmax.f32 %v666_v24, 0.0  ;;  %v669_v50 = vmax.f32 %v667_v47, 0.0 }
 0x20c   : > { %v689_v51 = vadd.f32 %v685_v48, %v669_v50  ;;  %v688_v53 = vadd.f32 %v684_v33, %v668_v49 }
 0x20e   : > { %v691_v56 = vpack.c.bf16 %v689_v51, %v688_v53 }
 0x210   : > { %897 = vmatpush3.bf16.msra.mxu1 %v691_v56 }
 0x213   : > { %899 = vmatmul.mubr.msk.bf16.vlgmr.msra.gmra.mxu1 %vm338_vm1, %v690_v57 }
 0x2d3   : > { %v741_v58 = vpop.f32.mrf.mxu1 }
 0x2d4   : > { %v742_v59 = vadd.f32 %v741_v58, %v697_v52 }
 0x2d5   : > { %v900_v61 = vpop.f32.mrf.mxu1 }
 0x2d6   : > { %v748_v63 = vadd.f32 %v742_v59, %v1159_v5 }
 0x2d7   : > { %v744_v1 = vpop.f32.mrf.mxu1 }
 0x2d8   : > { %v756_v2 = vmul.f32 %v858_v60, %v748_v63  ;;  %v745_v3 = vadd.f32 %v744_v1, %v702_v0 }
 0x2d9   : > { %v901_v4 = vpop.f32.mrf.mxu1 }
 0x2da   : > { %758 = vst [vmem:[%s309_s22] sm:$0xff] %v756_v2  ;;  %v749_v31 = vadd.f32 %v745_v3, %v1161_v6 }
 0x2dc   : > { %v757_v7 = vmul.f32 %v858_v60, %v749_v31 }
 0x2de   : > { %759 = vst [vmem:[%s309_s22 + $0x8] sm:$0xff] %v757_v7 }
 0x2df   : > { %987 = shalt.err (!%p984_p3)
}
 0x2e0   : > { %s988_s19 = scalar_lea.hbm %s1346_s26, 256  ;;  %s992_s22 = scalar_lea.hbm %s1396_s8, 512 }
 0x2e1   : > { %p989_p4 = scmp.ne.s32.totalorder %s1346_s26, %s988_s19  ;;  %p993_p9 = scmp.lt.s32.totalorder %s1346_s26, %s1396_s8 }
 0x2e2   : > { %p994_p10 = scmp.lt.s32.totalorder %s992_s22, %s988_s19 }
 0x2e3   : > { %p990_p7 = pnand %p989_p4, %p1127_p5 }
 0x2e4   : > { %p995_p11 = por %p994_p10, %p993_p9 }
 0x2e5   : > { %p991_p8 = pneg %p990_p7 }
 0x2e7   : > { %p996_p12 = pnand %p995_p11, %p991_p8 }
 0x2e9   : > { %999 = shalt.err (!%p996_p12)
}
 0x2ea   : > { %s1042_s25 = smov 128   ;;  %s1043_s13 = smov 8  }
 0x2eb   : > { %904 = dma.vmem_to_hbm [thread:$0]  (%p1127_p5), %s1341_s23, 256, %s1346_s26, %s1348_s12, %s1042_s25, %s1042_s25, %s1043_s13  }
 0x2ec PF: > { %p910_p13 = scmp.ge.s32.totalorder %s1034_s30, 2  ;;  %s789_s9 = sand.u32 1, %s1022_s27  }
 0x2ed   : > { %s790_s20 = scalar_lea.sflag [#allocation3], %s789_s9 }
 0x2ee   : > { %p907_p0 = pnand %p910_p13, %p1131_p6 }
 0x2f0   : > { %p908_p1 = pneg %p907_p0 }
 0x2f2   : > { %1017 = dma.done.wait (%p908_p1), %s790_s20, 256  }
 0x2f3   : > { %1019 = vsyncadd (%p908_p1), %s790_s20, 4294967040  ;;  %p18_p2 = scmp.ge.s32.totalorder %s1114_s11, 4   ;;  %s1399_s27 = smov %s1026_s28 }
 0x2f4   : > { %s1400_s28 = smov %s1030_s29  ;;  %s1401_s29 = smov %s1125_s14 }
 0x2f5   : > { %s1402_s30 = smov %s1114_s11  ;;  %20 = sbr.rel (!%p18_p2) target bundleno = 3 (0x3), region = 90 }
 0x2fa   :  { %795 = vsyncpa [#allocation3], 1 }
 0x2fb   :  { %797 = vsyncpa [#allocation3 + $0x1], 1 }

</bundles_post_ra>
